<compile_context>
chip_gen: v7x
topology: tpu7x:2x2x1
jax: 0.10.0
libtpu: 0.0.40
codegen_flags: <defaults>
</compile_context>

<pallas_src>
import jax
import jax.numpy as jnp
from jax.experimental import pallas as pl
from jax.experimental.pallas import tpu as pltpu

LANES = 128          # vreg lane width: output last dim must be a multiple of this
MAX_TILE_ROWS = 512  # 512x128 f32 = 256 KiB per operand tile (~2 MiB live w/ 4 ops x2 bufs)


def _per_atom_mae_kernel(pred_ref, target_ref, natoms_ref, out_ref):
    # Load tiles, compute in f32 on the VPU, cast once on store.
    pred = pred_ref[...].astype(jnp.float32)
    target = target_ref[...].astype(jnp.float32)
    natoms = natoms_ref[...].astype(jnp.float32)
    # |p - t| / n  ==  |p/n - t/n| (up to 1-ulp rounding differences).
    out_ref[...] = (jnp.abs(pred - target) / natoms).astype(out_ref.dtype)


def per_atom_mae_loss(pred, target, natoms):
    """JAX/Pallas equivalent of PerAtomMAELoss.forward (reduction='none')."""
    # Same shape contract as the PyTorch module.
    assert target.ndim == 1 or (target.ndim == 2 and target.shape[1] == 1), (
        "target must be (N,) or (N, 1)"
    )
    orig_shape = target.shape
    out_dtype = target.dtype

    pred_f = jnp.reshape(pred, (-1,))
    target_f = jnp.reshape(target, (-1,))
    natoms_f = jnp.reshape(natoms, (-1,))
    n = target_f.shape[0]
    assert pred_f.shape[0] == n and natoms_f.shape[0] == n

    # Lane-dense 2-D layout: (rows_pad, 128), rows_pad a multiple of the row tile.
    rows = -(-n // LANES)
    if rows >= MAX_TILE_ROWS:
        tile_rows = MAX_TILE_ROWS
    else:
        tile_rows = max(8, ((rows + 7) // 8) * 8)   # respect (8,128) sublane tiling
    rows_pad = ((rows + tile_rows - 1) // tile_rows) * tile_rows
    n_pad = rows_pad * LANES

    pad = n_pad - n
    if pad:
        pred_f = jnp.pad(pred_f, (0, pad))
        target_f = jnp.pad(target_f, (0, pad))
        # natoms padded with 1 so the padded region is 0/1 = 0 (no inf/nan).
        natoms_f = jnp.pad(natoms_f, (0, pad), constant_values=1)

    pred2 = jnp.reshape(pred_f, (rows_pad, LANES))
    target2 = jnp.reshape(target_f, (rows_pad, LANES))
    natoms2 = jnp.reshape(natoms_f, (rows_pad, LANES))

    grid = (rows_pad // tile_rows,)
    tile_spec = pl.BlockSpec((tile_rows, LANES), lambda i: (i, 0))

    out2 = pl.pallas_call(
        _per_atom_mae_kernel,
        out_shape=jax.ShapeDtypeStruct((rows_pad, LANES), out_dtype),
        grid=grid,
        in_specs=[tile_spec, tile_spec, tile_spec],
        out_specs=tile_spec,
        compiler_params=pltpu.CompilerParams(
            dimension_semantics=("parallel",),
        ),
    )(pred2, target2, natoms2)

    out = jnp.reshape(out2, (n_pad,))[:n]
    return jnp.reshape(out, orig_shape)


if __name__ == "__main__":
    key = jax.random.PRNGKey(0)
    k_pred, k_target, k_natoms = jax.random.split(key, 3)

    # Small, module-consistent shapes: 8 graphs, scalar target per graph.
    N = 8
    pred = jax.random.normal(k_pred, (N, 1), dtype=jnp.float32) * 10.0
    target = jax.random.normal(k_target, (N, 1), dtype=jnp.float32) * 10.0
    natoms = jax.random.randint(k_natoms, (N,), 1, 64).astype(jnp.float32)

    out = jax.block_until_ready(per_atom_mae_loss(pred, target, natoms))

    # Reference check in plain JAX (PyTorch formulation: |p/n - t/n|).
    _n = jnp.reshape(natoms, target.shape)
    ref = jnp.abs(pred / _n - target / _n)
    assert out.shape == target.shape and out.dtype == target.dtype
    assert jnp.allclose(out, ref, rtol=1e-6, atol=1e-6)

    # Also exercise the 1-D target path.
    out1d = jax.block_until_ready(
        per_atom_mae_loss(pred[:, 0], target[:, 0], natoms)
    )
    ref1d = jnp.abs(pred[:, 0] / natoms - target[:, 0] / natoms)
    assert out1d.shape == (N,) and out1d.dtype == target.dtype
    assert jnp.allclose(out1d, ref1d, rtol=1e-6, atol=1e-6)

    # A larger case that exercises the multi-tile pipelined grid path.
    M = 3 * MAX_TILE_ROWS * LANES + 37   # non-multiple -> padding + slice path
    kp, kt, kn = jax.random.split(jax.random.PRNGKey(1), 3)
    pred_l = jax.random.normal(kp, (M,), dtype=jnp.float32) * 5.0
    target_l = jax.random.normal(kt, (M,), dtype=jnp.float32) * 5.0
    natoms_l = jax.random.randint(kn, (M,), 1, 200).astype(jnp.float32)
    out_l = jax.block_until_ready(per_atom_mae_loss(pred_l, target_l, natoms_l))
    ref_l = jnp.abs(pred_l / natoms_l - target_l / natoms_l)
    assert out_l.shape == (M,)
    assert jnp.allclose(out_l, ref_l, rtol=1e-6, atol=1e-6)

    print("KERNEL_OK")
</pallas_src>

<mosaic_0001>
module attributes {stable_mosaic.version = 11 : i64} {
  func.func @_per_atom_mae_kernel(%arg0: i32, %arg1: memref<8x128xf32, #tpu.memory_space<vmem>>, %arg2: memref<8x128xf32, #tpu.memory_space<vmem>>, %arg3: memref<8x128xf32, #tpu.memory_space<vmem>>, %arg4: memref<8x128xf32, #tpu.memory_space<vmem>>) attributes {dimension_semantics = [#tpu.dimension_semantics<parallel>], iteration_bounds = array<i64: 1>, scalar_prefetch = 0 : i64, scratch_operands = 0 : i64, tpu.core_type = #tpu.core_type<tc>, window_params = [{transform_indices = @transform_0, window_bounds = array<i64: 8, 128>}, {transform_indices = @transform_1, window_bounds = array<i64: 8, 128>}, {transform_indices = @transform_2, window_bounds = array<i64: 8, 128>}, {transform_indices = @transform_3, window_bounds = array<i64: 8, 128>}]} {
    %c0 = arith.constant 0 : index
    %c0_0 = arith.constant 0 : index
    %0 = vector.load %arg1[%c0, %c0_0] : memref<8x128xf32, #tpu.memory_space<vmem>>, vector<8x128xf32>
    %c0_1 = arith.constant 0 : index
    %c0_2 = arith.constant 0 : index
    %1 = vector.load %arg2[%c0_1, %c0_2] : memref<8x128xf32, #tpu.memory_space<vmem>>, vector<8x128xf32>
    %c0_3 = arith.constant 0 : index
    %c0_4 = arith.constant 0 : index
    %2 = vector.load %arg3[%c0_3, %c0_4] : memref<8x128xf32, #tpu.memory_space<vmem>>, vector<8x128xf32>
    %3 = arith.subf %0, %1 : vector<8x128xf32>
    %4 = math.absf %3 : vector<8x128xf32>
    %5 = arith.divf %4, %2 : vector<8x128xf32>
    %c0_5 = arith.constant 0 : index
    %c0_6 = arith.constant 0 : index
    %6 = vector.load %arg4[%c0_5, %c0_6] : memref<8x128xf32, #tpu.memory_space<vmem>>, vector<8x128xf32>
    tpu.vector_store %arg4[%c0_5, %c0_6], %5 {strides = array<i32>} : memref<8x128xf32, #tpu.memory_space<vmem>>, vector<8x128xf32>,
    return
  }
  func.func @transform_0(%arg0: i32) -> (i32, i32) {
    %c0_i32 = arith.constant 0 : i32
    %c0_i32_0 = arith.constant 0 : i32
    return %arg0, %c0_i32 : i32, i32
  }
  func.func @transform_1(%arg0: i32) -> (i32, i32) {
    %c0_i32 = arith.constant 0 : i32
    %c0_i32_0 = arith.constant 0 : i32
    return %arg0, %c0_i32 : i32, i32
  }
  func.func @transform_2(%arg0: i32) -> (i32, i32) {
    %c0_i32 = arith.constant 0 : i32
    %c0_i32_0 = arith.constant 0 : i32
    return %arg0, %c0_i32 : i32, i32
  }
  func.func @transform_3(%arg0: i32) -> (i32, i32) {
    %c0_i32 = arith.constant 0 : i32
    %c0_i32_0 = arith.constant 0 : i32
    return %arg0, %c0_i32 : i32, i32
  }
}

</mosaic_0001>

<bundles_post_ra>
// kernel: tpu_custom_call.1
= control target key start
LH: loop header
LB: loop body
LE: loop exit
PB: predicated region body
PF: predicated region fallthrough
CT: control target
= control target key end

     0   :  { %8 = vsyncpa [#allocation3], 0  ;;  %s246_s0 = inlined_call_operand.hbm [shape: f32[8,128], index: 0, kind: input, shape index: {}]   ;;  %s247_s1 = inlined_call_operand.hbm [shape: f32[8,128], index: 1, kind: input, shape index: {}]   ;;  %s248_s2 = inlined_call_operand.hbm [shape: f32[8,128], index: 2, kind: input, shape index: {}]   ;;  %s249_s3 = inlined_call_operand.hbm [shape: f32[8,128], index: 3, kind: output, shape index: {}]  }
   0x1   :  { %9 = vsyncpa [#allocation6], 0 }
   0x2   :  { %10 = vsyncpa [#allocation4], 0  ;;  %s174_s12 = smov [#allocation5]   ;;  %s175_s14 = smov [#allocation2]  }
   0x3   :  { %s27_s13 = sshll.u32 %s174_s12, 4  ;;  %s17_s15 = sshll.u32 %s175_s14, 4  ;;  %s28_s13 = int_to_ptr.vmem [resolvable:$true] %s27_s13  ;;  %s18_s15 = int_to_ptr.vmem [resolvable:$true] %s17_s15 }
   0x4   :  { %s80_s18 = scalar_lea.hbm %s247_s1, 128 }
   0x5   :  { %p81_p0 = scmp.ne.s32.totalorder %s247_s1, %s80_s18  ;;  %p84_p1 = scmp.lt.u32.totalorder %s80_s18, %s247_s1 }
   0x7   :  { %p86_p2 = pnand %p84_p1, %p81_p0 }
   0x9   :  { %89 = shalt.err (!%p86_p2)
}
   0xa   :  { %s90_s23 = scalar_lea.vmem %s28_s13, 128  ;;  %p95_p4 = scmp.lt.s32.totalorder %s28_s13, %s28_s13 }
   0xb   :  { %p91_p3 = scmp.ne.s32.totalorder %s28_s13, %s90_s23  ;;  %p96_p5 = scmp.lt.s32.totalorder %s90_s23, %s90_s23 }
   0xd   :  { %p97_p6 = por %p96_p5, %p95_p4 }
   0xf   :  { %p98_p7 = pnand %p97_p6, %p91_p3 }
  0x11   :  { %101 = shalt.err (!%p98_p7)
}
  0x12   :  { %30 = dma.hbm_to_vmem [thread:$0]  %s247_s1, 128, %s28_s13, [#allocation6]  }
  0x13   :  { %s102_s28 = scalar_lea.hbm %s246_s0, 128 }
  0x14   :  { %p103_p8 = scmp.ne.s32.totalorder %s246_s0, %s102_s28  ;;  %p106_p9 = scmp.lt.u32.totalorder %s102_s28, %s246_s0 }
  0x16   :  { %p108_p10 = pnand %p106_p9, %p103_p8 }
  0x18   :  { %111 = shalt.err (!%p108_p10)
}
  0x19   :  { %s112_s6 = scalar_lea.vmem %s18_s15, 128  ;;  %p117_p12 = scmp.lt.s32.totalorder %s18_s15, %s18_s15 }
  0x1a   :  { %p113_p11 = scmp.ne.s32.totalorder %s18_s15, %s112_s6  ;;  %p118_p13 = scmp.lt.s32.totalorder %s112_s6, %s112_s6 }
  0x1c   :  { %p119_p0 = por %p118_p13, %p117_p12 }
  0x1e   :  { %p120_p1 = pnand %p119_p0, %p113_p11 }
  0x20   :  { %123 = shalt.err (!%p120_p1)
}
  0x21   :  { %20 = dma.hbm_to_vmem [thread:$0]  %s246_s0, 128, %s18_s15, [#allocation3]  }
  0x22   :  { %s176_s8 = smov [#allocation7]   ;;  %s124_s12 = scalar_lea.hbm %s248_s2, 128 }
  0x23   :  { %s37_s9 = sshll.u32 %s176_s8, 4  ;;  %p125_p2 = scmp.ne.s32.totalorder %s248_s2, %s124_s12  ;;  %s38_s9 = int_to_ptr.vmem [resolvable:$true] %s37_s9 }
  0x24   :  { %p128_p3 = scmp.lt.u32.totalorder %s124_s12, %s248_s2 }
  0x26   :  { %p130_p4 = pnand %p128_p3, %p125_p2 }
  0x28   :  { %133 = shalt.err (!%p130_p4)
}
  0x29   :  { %s134_s18 = scalar_lea.vmem %s38_s9, 128  ;;  %p139_p6 = scmp.lt.s32.totalorder %s38_s9, %s38_s9 }
  0x2a   :  { %p135_p5 = scmp.ne.s32.totalorder %s38_s9, %s134_s18  ;;  %p140_p7 = scmp.lt.s32.totalorder %s134_s18, %s134_s18 }
  0x2c   :  { %p141_p8 = por %p140_p7, %p139_p6 }
  0x2e   :  { %p142_p9 = pnand %p141_p8, %p135_p5 }
  0x30   :  { %145 = shalt.err (!%p142_p9)
}
  0x31   :  { %40 = dma.hbm_to_vmem [thread:$0]  %s248_s2, 128, %s38_s9, [#allocation6]  }
  0x32   :  { %168 = dma.done.wait [#allocation3], 128  }
  0x33   :  { %169 = vsyncadd [#allocation3], 4294967168 }
  0x34   :  { %170 = dma.done.wait [#allocation6], 256  }
  0x35   :  { %171 = vsyncadd [#allocation6], 4294967040  ;;  %v52_v0 = vld [vmem:[#allocation7] sm:$0xff]  ;;  %v50_v1 = vld [vmem:[#allocation2] sm:$0xff]  ;;  %s177_s19 = smov [#allocation8]  }
  0x36   :  { %v51_v2 = vld [vmem:[#allocation5] sm:$0xff]  ;;  %78 = vrcp.f32 %v52_v0  ;;  %s64_s20 = sshll.u32 %s177_s19, 4  ;;  %s65_s20 = int_to_ptr.vmem [resolvable:$true] %s64_s20 }
  0x37   :  { %v53_v3 = vsub.f32 %v50_v1, %v51_v2  ;;  %s146_s21 = scalar_lea.vmem %s65_s20, 128  ;;  %p151_p11 = scmp.lt.s32.totalorder %s65_s20, %s65_s20 }
  0x38   :  { %p147_p10 = scmp.ne.s32.totalorder %s65_s20, %s146_s21  ;;  %p152_p12 = scmp.lt.s32.totalorder %s146_s21, %s146_s21 }
  0x39   :  { %v54_v4 = vand.u32 2147483647, %v53_v3 }
  0x3a   :  { %p153_p13 = por %p152_p12, %p151_p11 }
  0x3c   :  { %p154_p0 = pnand %p153_p13, %p147_p10 }
  0x40   :  { %v79_v5 = vpop.eup %78 }
  0x41   :  { %v56_v6 = vmul.f32 %v79_v5, %v54_v4 }
  0x43   :  { %57 = vst [vmem:[#allocation8] sm:$0xff] %v56_v6 }
  0x44   :  { %157 = shalt.err (!%p154_p0)
}
  0x45   :  { %s158_s23 = scalar_lea.hbm %s249_s3, 128 }
  0x46   :  { %p159_p1 = scmp.ne.s32.totalorder %s249_s3, %s158_s23  ;;  %p162_p2 = scmp.lt.u32.totalorder %s158_s23, %s249_s3 }
  0x48   :  { %p164_p3 = pnand %p162_p2, %p159_p1 }
  0x4a   :  { %167 = shalt.err (!%p164_p3)
}
  0x4b   :  { %67 = dma.vmem_to_hbm [thread:$0]  %s65_s20, 128, %s249_s3, [#allocation4]  }
  0x4c   :  { %172 = dma.done.wait [#allocation4], 128  }
  0x4d   :  { %173 = vsyncadd [#allocation4], 4294967168 }
  0x4e   :  { %71 = vsyncpa [#allocation3], 1 }
  0x4f   :  { %72 = vsyncpa [#allocation6], 1 }
  0x50   :  { %73 = vsyncpa [#allocation4], 1 }

</bundles_post_ra>
